<compile_context>
chip_gen: v5e
topology: v5e:2x2
jax: 0.10.0
libtpu: 0.0.40
codegen_flags: <defaults>
</compile_context>

<pallas_src>
import jax
import jax.numpy as jnp
from jax.experimental import pallas as pl
from jax.experimental.pallas import tpu as pltpu


def _make_dma_copy_kernel(chunks):
    """Build an HBM->HBM copy kernel.

    chunks: tuple of (start, size) static slices along axis 0.  Empty tuple
    means "copy the whole array with a single DMA".
    """
    if not chunks:
        def kernel(x_hbm, o_hbm, sem):
            cp = pltpu.make_async_copy(x_hbm, o_hbm, sem)
            cp.start()
            cp.wait()
        return kernel

    def kernel(x_hbm, o_hbm, sems):
        cps = []
        # Start every chunk's DMA first (multiple DMAs in flight), then wait.
        for i, (start, size) in enumerate(chunks):
            cp = pltpu.make_async_copy(
                x_hbm.at[pl.ds(start, size)],
                o_hbm.at[pl.ds(start, size)],
                sems.at[i],
            )
            cp.start()
            cps.append(cp)
        for cp in cps:
            cp.wait()
    return kernel


def identity_pallas(x: jax.Array) -> jax.Array:
    """Identity op implemented as a direct HBM->HBM DMA in a Pallas TPU kernel."""
    if x.size == 0:
        return x

    orig_shape = x.shape
    # Scalars: give the DMA a 2-D view; reshape back afterwards (bitcast, free).
    squeeze_back = False
    if x.ndim == 0:
        x = x.reshape(1, 1)
        squeeze_back = True

    itemsize = jnp.dtype(x.dtype).itemsize
    total_bytes = int(x.size) * itemsize

    # For large arrays, split the copy into a handful of big contiguous
    # leading-axis chunks (>= ~8 MiB each, at most 8) so several DMAs are in
    # flight at once.  Small arrays use a single whole-array DMA.
    TARGET_CHUNK_BYTES = 8 * 1024 * 1024
    chunks = ()
    lead = x.shape[0]
    if lead >= 2 and total_bytes >= 2 * TARGET_CHUNK_BYTES:
        num_chunks = min(8, lead, max(2, total_bytes // TARGET_CHUNK_BYTES))
        base, rem = divmod(lead, num_chunks)
        chunk_list = []
        start = 0
        for i in range(num_chunks):
            size = base + (1 if i < rem else 0)
            if size > 0:
                chunk_list.append((start, size))
            start += size
        chunks = tuple(chunk_list)

    if chunks:
        scratch = [pltpu.SemaphoreType.DMA((len(chunks),))]
    else:
        scratch = [pltpu.SemaphoreType.DMA(())]

    out = pl.pallas_call(
        _make_dma_copy_kernel(chunks),
        out_shape=jax.ShapeDtypeStruct(x.shape, x.dtype),
        in_specs=[pl.BlockSpec(memory_space=pl.ANY)],   # raw HBM ref, no auto-DMA
        out_specs=pl.BlockSpec(memory_space=pl.ANY),    # raw HBM ref, written by DMA
        scratch_shapes=scratch,
    )(x)

    if squeeze_back:
        out = out.reshape(orig_shape)
    return out


class NetJax:
    """JAX/Pallas equivalent of the PyTorch `Net` module (identity forward)."""

    def __init__(self):
        # The PyTorch module defines no parameters ("build your net here" is
        # a stub), so there is nothing to initialize.
        pass

    def __call__(self, x: jax.Array) -> jax.Array:
        return identity_pallas(x)


if __name__ == "__main__":
    key = jax.random.PRNGKey(0)
    # NCHW input, small shapes: batch=2, channels=4, spatial=16x16.
    x = jax.random.normal(key, (2, 4, 16, 16), dtype=jnp.float32)

    net = NetJax()
    y = net(x)
    jax.block_until_ready(y)

    assert y.shape == x.shape and y.dtype == x.dtype
    assert jnp.array_equal(y, x), "identity kernel mismatch"
    print("KERNEL_OK")
</pallas_src>

<mosaic_0001>
module attributes {stable_mosaic.version = 11 : i64} {
  func.func @kernel(%arg0: memref<2x4x16x16xf32, #tpu.memory_space<any>>, %arg1: memref<2x4x16x16xf32, #tpu.memory_space<any>>, %arg2: memref<!tpu.dma_semaphore, #tpu.memory_space<semaphore_mem>>) attributes {dimension_semantics = [], scalar_prefetch = 0 : i64, scratch_operands = 1 : i64, tpu.core_type = #tpu.core_type<tc>} {
    tpu.enqueue_dma source(%arg0 : memref<2x4x16x16xf32, #tpu.memory_space<any>>) target(%arg1 : memref<2x4x16x16xf32, #tpu.memory_space<any>>) target_semaphore(%arg2 : memref<!tpu.dma_semaphore, #tpu.memory_space<semaphore_mem>>)
    tpu.wait_dma2 semaphore(%arg2 : memref<!tpu.dma_semaphore, #tpu.memory_space<semaphore_mem>>) src(%arg0 : memref<2x4x16x16xf32, #tpu.memory_space<any>>) dst(%arg1 : memref<2x4x16x16xf32, #tpu.memory_space<any>>)
    return
  }
}

</mosaic_0001>

<bundles_post_ra>
// kernel: tpu_custom_call.1
= control target key start
LH: loop header
LB: loop body
LE: loop exit
PB: predicated region body
PF: predicated region fallthrough
CT: control target
= control target key end

     0   :  { %s34_s12 = smov [#allocation2]   ;;  %s35_s13 = smov [#allocation3]   ;;  %s53_s0 = inlined_call_operand.hbm [shape: f32[2,4,16,16], index: 0, kind: input, shape index: {}]   ;;  %s54_s1 = inlined_call_operand.hbm [shape: f32[2,4,16,16], index: 1, kind: output, shape index: {}]  }
   0x1   :  { %s10_s8 = sshll.u32 %s53_s0, 4  ;;  %s12_s11 = sshll.u32 %s54_s1, 4  ;;  %s11_s8 = int_to_ptr.hbm [resolvable:$true] %s10_s8  ;;  %s13_s11 = int_to_ptr.hbm [resolvable:$true] %s12_s11 }
   0x2   :  { %s36_s14 = smov 0  }
   0x3   :  { %16 = dma.general %s11_s8, 2048, %s13_s11, %s34_s12, %s35_s13, [#allocation4], %s36_s14, 0  }
   0x4   :  { %32 = dma.done.wait [#allocation2], 2048 }
   0x5   :  { %33 = vsyncadd [#allocation2], 4294965248 }
   0x6   :  { %22 = vsyncmov [#allocation2] }
   0x9   :  { %s23_s15 = vpop.sfrf %22 }
   0xa   :  { %p28_p0 = scmp.ne.s32.totalorder %s23_s15, 0 }
   0xc   :  { %27 = shalt.err (%p28_p0)  }

</bundles_post_ra>
